<compile_context>
chip_gen: v6e
topology: v6e:2x2x1
jax: 0.10.0
libtpu: 0.0.40
codegen_flags: <defaults>
</compile_context>

<pallas_src>
import jax
import jax.numpy as jnp
import numpy as np
from jax.experimental import pallas as pl
from jax.experimental.pallas import tpu as pltpu


def attn_kernel(qry_ref, dp_ref, qm_ref, wy_ref, wc_ref, small_ref, lb_ref,
                out_ref):
    TB, Q, H = qry_ref.shape

    qry = qry_ref[...]                                    # (TB, Q, H), compute dtype
    qry2d = qry.reshape(TB * Q, H)                        # merge leading dims (cheap)

    # --- MXU: one tall tile for the query encoder (Wy) --------------------
    qry_enc = jnp.dot(qry2d, wy_ref[...],
                      preferred_element_type=jnp.float32).reshape(TB, Q, H)

    # --- MXU: fused doc/prev encoders + Wt: [doc,prev] @ [[Wh,0],[Wr,Wt]] --
    combo = jnp.dot(dp_ref[...], wc_ref[...],
                    preferred_element_type=jnp.float32)   # (TB, 2H), f32
    ctx = combo[:, :H]                                    # doc@Wh + prev@Wr
    rt_enc = combo[:, H:] + small_ref[1:2, :]             # prev@Wt + bt

    # --- VPU/EUP: tanh attention features (f32 elementwise) ---------------
    b_mt = small_ref[0:1, :].reshape(1, 1, H)             # by + bh + br
    mt = jnp.tanh(qry_enc + ctx[:, None, :] + b_mt)       # (TB, Q, H)

    # --- logits via VPU multiply + lane reduce (no N=1 MXU pass) ----------
    lw_row = small_ref[2:3, :].reshape(1, 1, H)
    scores = jnp.sum(mt * lw_row, axis=-1) + lb_ref[0, 0]  # (TB, Q), Q on lanes

    # --- masked softmax over Q, mask fused with renormalization -----------
    m = jnp.max(scores, axis=-1, keepdims=True)
    e = jnp.exp(scores - m) * qm_ref[...]
    alpha = e / jnp.sum(e, axis=-1, keepdims=True)        # (TB, Q)

    # --- weighted query + output ------------------------------------------
    w_qry = jnp.sum(qry.astype(jnp.float32) * alpha[:, :, None], axis=1)  # (TB, H)
    out_ref[...] = (w_qry + jnp.tanh(rt_enc)).astype(out_ref.dtype)


def attn_layer_pallas(qry_h, doc_i, prev_rt, qm, params, *,
                      block_b=None, compute_dtype=jnp.float32):
    B, Q, H = qry_h.shape
    wy, by, wh, bh, wr, br, lw, lb, wt, bt = params

    # ---- operand fusion (done once, in f32) -------------------------------
    doc_prev = jnp.concatenate([doc_i, prev_rt], axis=-1)             # (B, 2H)
    zeros_hh = jnp.zeros((H, H), jnp.float32)
    w_combo = jnp.concatenate(
        [jnp.concatenate([wh, zeros_hh], axis=1),
         jnp.concatenate([wr, wt], axis=1)], axis=0)                  # (2H, 2H)
    small = jnp.concatenate([by + bh + br, bt, lw.reshape(1, H)], axis=0)  # (3, H)
    lb_smem = lb.reshape(1, 1).astype(jnp.float32)

    # matmul operands in compute_dtype (bf16 path keeps f32 accumulation and
    # f32 elementwise math inside the kernel — v5e-friendly).
    qry_c = qry_h.astype(compute_dtype)
    dp_c = doc_prev.astype(compute_dtype)
    wy_c = wy.astype(compute_dtype)
    wc_c = w_combo.astype(compute_dtype)
    qm_f = qm.astype(jnp.float32)
    small = small.astype(jnp.float32)

    # ---- batch tiling ------------------------------------------------------
    if block_b is None:
        block_b = 64
    block_b = min(block_b, B)
    if block_b < B:
        block_b = -(-block_b // 8) * 8        # sublane-align partial batch blocks
    nb = -(-B // block_b)
    B_pad = nb * block_b

    if B_pad != B:
        pad = B_pad - B
        qry_c = jnp.pad(qry_c, ((0, pad), (0, 0), (0, 0)))
        dp_c = jnp.pad(dp_c, ((0, pad), (0, 0)))
        # pad mask rows with ones so padded rows don't produce 0/0.
        qm_f = jnp.pad(qm_f, ((0, pad), (0, 0)), constant_values=1.0)

    out = pl.pallas_call(
        attn_kernel,
        out_shape=jax.ShapeDtypeStruct((B_pad, H), jnp.float32),
        grid_spec=pltpu.PrefetchScalarGridSpec(
            num_scalar_prefetch=0,
            grid=(nb,),
            in_specs=[
                pl.BlockSpec((block_b, Q, H), lambda b: (b, 0, 0)),    # qry_h
                pl.BlockSpec((block_b, 2 * H), lambda b: (b, 0)),      # [doc, prev]
                pl.BlockSpec((block_b, Q), lambda b: (b, 0)),          # qm
                pl.BlockSpec((H, H), lambda b: (0, 0)),                # Wy
                pl.BlockSpec((2 * H, 2 * H), lambda b: (0, 0)),        # [[Wh,0],[Wr,Wt]]
                pl.BlockSpec((3, H), lambda b: (0, 0)),                # biases + lw row
                pl.BlockSpec(memory_space=pltpu.MemorySpace.SMEM),     # lb scalar
            ],
            out_specs=pl.BlockSpec((block_b, H), lambda b: (b, 0)),
        ),
        compiler_params=pltpu.CompilerParams(
            dimension_semantics=("parallel",),
            vmem_limit_bytes=32 * 1024 * 1024,
        ),
    )(qry_c, dp_c, qm_f, wy_c, wc_c, small, lb_smem)

    # Lane-dense (B, H) inside the kernel; legacy (B, H, 1) contract outside.
    return out[:B].reshape(B, H, 1)


def attn_layer_ref(qry_h, doc_i, prev_rt, qm, params):
    """Pure-JAX reference mirroring the PyTorch forward."""
    wy, by, wh, bh, wr, br, lw, lb, wt, bt = params
    qry_enc = qry_h @ wy + by                         # (B, Q, H)
    doc_enc = doc_i @ wh + bh                         # (B, H)
    prev_enc = prev_rt @ wr + br                      # (B, H)
    ctx = (doc_enc + prev_enc)[:, None, :]            # (B, 1, H)
    mt = jnp.tanh(qry_enc + ctx)                      # (B, Q, H)
    scores = (mt @ lw + lb)[..., 0]                   # (B, Q)
    alpha = jax.nn.softmax(scores, axis=1)
    alpha = alpha * qm
    alpha = alpha / jnp.sum(alpha, axis=1, keepdims=True)
    w_qry = jnp.einsum("bqh,bq->bh", qry_h, alpha)
    rt = w_qry + jnp.tanh(prev_rt @ wt + bt)
    return rt[..., None]                              # (B, H, 1)


def init_params(key, hidden_dim):
    ks = jax.random.split(key, 10)
    scale = 1.0 / np.sqrt(hidden_dim)
    mk = lambda k, shape: jax.random.uniform(k, shape, jnp.float32, -scale, scale)
    wy = mk(ks[0], (hidden_dim, hidden_dim));  by = mk(ks[1], (1, hidden_dim))
    wh = mk(ks[2], (hidden_dim, hidden_dim));  bh = mk(ks[3], (1, hidden_dim))
    wr = mk(ks[4], (hidden_dim, hidden_dim));  br = mk(ks[5], (1, hidden_dim))
    lw = mk(ks[6], (hidden_dim, 1));           lb = mk(ks[7], (1, 1))
    wt = mk(ks[8], (hidden_dim, hidden_dim));  bt = mk(ks[9], (1, hidden_dim))
    return (wy, by, wh, bh, wr, br, lw, lb, wt, bt)


if __name__ == "__main__":
    key = jax.random.PRNGKey(0)
    B, Q, H = 2, 8, 32
    k1, k2, k3, k4, k5 = jax.random.split(key, 5)

    qry_h = jax.random.normal(k1, (B, Q, H), jnp.float32)
    doc_i = jax.random.normal(k2, (B, H), jnp.float32)
    prev_rt = jax.random.normal(k3, (B, H), jnp.float32)
    qm = jnp.array([[1, 1, 1, 1, 1, 0, 0, 0],
                    [1, 1, 1, 1, 1, 1, 1, 0]], dtype=jnp.float32)
    params = init_params(k4, H)

    # --- small-shape correctness check (f32) ------------------------------
    rt = jax.block_until_ready(attn_layer_pallas(qry_h, doc_i, prev_rt, qm, params))
    rt_ref = attn_layer_ref(qry_h, doc_i, prev_rt, qm, params)
    assert rt.shape == (B, H, 1), rt.shape
    np.testing.assert_allclose(np.asarray(rt), np.asarray(rt_ref),
                               atol=1e-4, rtol=1e-4)

    # --- larger batch: multi-step grid + batch padding path ---------------
    B2 = 50
    j1, j2, j3, j4 = jax.random.split(k5, 4)
    qry2 = jax.random.normal(j1, (B2, Q, H), jnp.float32)
    doc2 = jax.random.normal(j2, (B2, H), jnp.float32)
    prev2 = jax.random.normal(j3, (B2, H), jnp.float32)
    lens = jax.random.randint(j4, (B2,), 1, Q + 1)
    qm2 = (jnp.arange(Q)[None, :] < lens[:, None]).astype(jnp.float32)

    rt2 = jax.block_until_ready(
        attn_layer_pallas(qry2, doc2, prev2, qm2, params, block_b=16))
    rt2_ref = attn_layer_ref(qry2, doc2, prev2, qm2, params)
    np.testing.assert_allclose(np.asarray(rt2), np.asarray(rt2_ref),
                               atol=1e-4, rtol=1e-4)

    # --- bf16 matmul-input path (f32 accumulation & elementwise) ----------
    rt3 = jax.block_until_ready(
        attn_layer_pallas(qry2, doc2, prev2, qm2, params, block_b=16,
                          compute_dtype=jnp.bfloat16))
    np.testing.assert_allclose(np.asarray(rt3), np.asarray(rt2_ref),
                               atol=5e-2, rtol=5e-2)

    print("KERNEL_OK")
</pallas_src>

<mosaic_0001>
module attributes {stable_mosaic.version = 11 : i64} {
  func.func @attn_kernel(%arg0: i32, %arg1: memref<2x8x32xf32, #tpu.memory_space<vmem>>, %arg2: memref<2x64xf32, #tpu.memory_space<vmem>>, %arg3: memref<2x8xf32, #tpu.memory_space<vmem>>, %arg4: memref<32x32xf32, #tpu.memory_space<vmem>>, %arg5: memref<64x64xf32, #tpu.memory_space<vmem>>, %arg6: memref<3x32xf32, #tpu.memory_space<vmem>>, %arg7: memref<1x1xf32, #tpu.memory_space<smem>>, %arg8: memref<2x32xf32, #tpu.memory_space<vmem>>) attributes {dimension_semantics = [#tpu.dimension_semantics<parallel>], iteration_bounds = array<i64: 1>, scalar_prefetch = 0 : i64, scratch_operands = 0 : i64, tpu.core_type = #tpu.core_type<tc>, window_params = [{transform_indices = @transform_0, window_bounds = array<i64: 2, 8, 32>}, {transform_indices = @transform_1, window_bounds = array<i64: 2, 64>}, {transform_indices = @transform_2, window_bounds = array<i64: 2, 8>}, {pipeline_mode = #tpu.pipeline_mode<synchronous>, transform_indices = @transform_3, window_bounds = array<i64: 32, 32>}, {pipeline_mode = #tpu.pipeline_mode<synchronous>, transform_indices = @transform_4, window_bounds = array<i64: 64, 64>}, {pipeline_mode = #tpu.pipeline_mode<synchronous>, transform_indices = @transform_5, window_bounds = array<i64: 3, 32>}, {transform_indices = @transform_6, window_bounds = array<i64: 1, 1>}, {transform_indices = @transform_7, window_bounds = array<i64: 2, 32>}]} {
    %c0 = arith.constant 0 : index
    %c0_0 = arith.constant 0 : index
    %c0_1 = arith.constant 0 : index
    %0 = vector.load %arg1[%c0, %c0_0, %c0_1] : memref<2x8x32xf32, #tpu.memory_space<vmem>>, vector<2x8x32xf32>
    %1 = vector.shape_cast %0 : vector<2x8x32xf32> to vector<16x32xf32>
    %c0_2 = arith.constant 0 : index
    %c0_3 = arith.constant 0 : index
    %2 = vector.load %arg4[%c0_2, %c0_3] : memref<32x32xf32, #tpu.memory_space<vmem>>, vector<32x32xf32>
    %cst = arith.constant dense<0.000000e+00> : vector<16x32xf32>
    %3 = tpu.matmul %1, %2, %cst {dimension_numbers = #tpu.dot_dimension_numbers<[1], [0], [0], [1], [0, 0, 1, 1], [], []>} : vector<16x32xf32>, vector<32x32xf32>, vector<16x32xf32> -> vector<16x32xf32>
    %4 = vector.shape_cast %3 : vector<16x32xf32> to vector<2x8x32xf32>
    %c0_4 = arith.constant 0 : index
    %c0_5 = arith.constant 0 : index
    %5 = vector.load %arg2[%c0_4, %c0_5] : memref<2x64xf32, #tpu.memory_space<vmem>>, vector<2x64xf32>
    %c0_6 = arith.constant 0 : index
    %c0_7 = arith.constant 0 : index
    %6 = vector.load %arg5[%c0_6, %c0_7] : memref<64x64xf32, #tpu.memory_space<vmem>>, vector<64x64xf32>
    %cst_8 = arith.constant dense<0.000000e+00> : vector<2x64xf32>
    %7 = tpu.matmul %5, %6, %cst_8 {dimension_numbers = #tpu.dot_dimension_numbers<[1], [0], [0], [1], [0, 0, 1, 1], [], []>} : vector<2x64xf32>, vector<64x64xf32>, vector<2x64xf32> -> vector<2x64xf32>
    %8 = vector.extract_strided_slice %7 {offsets = [0, 0], sizes = [2, 32], strides = [1, 1]} : vector<2x64xf32> to vector<2x32xf32>
    %9 = vector.extract_strided_slice %7 {offsets = [0, 32], sizes = [2, 32], strides = [1, 1]} : vector<2x64xf32> to vector<2x32xf32>
    %c1 = arith.constant 1 : index
    %c0_9 = arith.constant 0 : index
    %10 = vector.load %arg6[%c1, %c0_9] : memref<3x32xf32, #tpu.memory_space<vmem>>, vector<1x32xf32>
    %11 = vector.broadcast %10 : vector<1x32xf32> to vector<2x32xf32>
    %12 = arith.addf %9, %11 : vector<2x32xf32>
    %c0_10 = arith.constant 0 : index
    %c0_11 = arith.constant 0 : index
    %13 = vector.load %arg6[%c0_10, %c0_11] : memref<3x32xf32, #tpu.memory_space<vmem>>, vector<1x32xf32>
    %14 = vector.shape_cast %13 : vector<1x32xf32> to vector<1x1x32xf32>
    %15 = vector.shape_cast %8 : vector<2x32xf32> to vector<2x1x32xf32>
    %16 = vector.broadcast %15 : vector<2x1x32xf32> to vector<2x8x32xf32>
    %17 = arith.addf %4, %16 : vector<2x8x32xf32>
    %18 = vector.broadcast %14 : vector<1x1x32xf32> to vector<2x8x32xf32>
    %19 = arith.addf %17, %18 : vector<2x8x32xf32>
    %20 = math.tanh %19 : vector<2x8x32xf32>
    %c2 = arith.constant 2 : index
    %c0_12 = arith.constant 0 : index
    %21 = vector.load %arg6[%c2, %c0_12] : memref<3x32xf32, #tpu.memory_space<vmem>>, vector<1x32xf32>
    %22 = vector.shape_cast %21 : vector<1x32xf32> to vector<1x1x32xf32>
    %23 = vector.broadcast %22 : vector<1x1x32xf32> to vector<2x8x32xf32>
    %24 = arith.mulf %20, %23 : vector<2x8x32xf32>
    %cst_13 = arith.constant dense<0.000000e+00> : vector<2x8xf32>
    %25 = vector.multi_reduction <add>, %24, %cst_13 [2] : vector<2x8x32xf32> to vector<2x8xf32>
    %c0_14 = arith.constant 0 : index
    %c0_15 = arith.constant 0 : index
    %26 = memref.load %arg7[%c0_14, %c0_15] : memref<1x1xf32, #tpu.memory_space<smem>>
    %27 = vector.broadcast %26 : f32 to vector<2x8xf32>
    %28 = arith.addf %25, %27 : vector<2x8xf32>
    %cst_16 = arith.constant dense<0xFF800000> : vector<2xf32>
    %29 = vector.multi_reduction <maximumf>, %28, %cst_16 [1] : vector<2x8xf32> to vector<2xf32>
    %30 = vector.shape_cast %29 : vector<2xf32> to vector<2x1xf32>
    %31 = vector.broadcast %30 : vector<2x1xf32> to vector<2x8xf32>
    %32 = arith.subf %28, %31 : vector<2x8xf32>
    %33 = math.exp %32 : vector<2x8xf32>
    %c0_17 = arith.constant 0 : index
    %c0_18 = arith.constant 0 : index
    %34 = vector.load %arg3[%c0_17, %c0_18] : memref<2x8xf32, #tpu.memory_space<vmem>>, vector<2x8xf32>
    %35 = arith.mulf %33, %34 : vector<2x8xf32>
    %cst_19 = arith.constant dense<0.000000e+00> : vector<2xf32>
    %36 = vector.multi_reduction <add>, %35, %cst_19 [1] : vector<2x8xf32> to vector<2xf32>
    %37 = vector.shape_cast %36 : vector<2xf32> to vector<2x1xf32>
    %38 = vector.broadcast %37 : vector<2x1xf32> to vector<2x8xf32>
    %39 = arith.divf %35, %38 : vector<2x8xf32>
    %40 = vector.shape_cast %39 : vector<2x8xf32> to vector<2x8x1xf32>
    %41 = vector.broadcast %40 : vector<2x8x1xf32> to vector<2x8x32xf32>
    %42 = arith.mulf %0, %41 : vector<2x8x32xf32>
    %cst_20 = arith.constant dense<0.000000e+00> : vector<2x32xf32>
    %43 = vector.multi_reduction <add>, %42, %cst_20 [1] : vector<2x8x32xf32> to vector<2x32xf32>
    %44 = math.tanh %12 : vector<2x32xf32>
    %45 = arith.addf %43, %44 : vector<2x32xf32>
    %c0_21 = arith.constant 0 : index
    %c0_22 = arith.constant 0 : index
    %46 = vector.load %arg8[%c0_21, %c0_22] : memref<2x32xf32, #tpu.memory_space<vmem>>, vector<2x32xf32>
    tpu.vector_store %arg8[%c0_21, %c0_22], %45 {strides = array<i32>} : memref<2x32xf32, #tpu.memory_space<vmem>>, vector<2x32xf32>,
    return
  }
  func.func @transform_0(%arg0: i32) -> (i32, i32, i32) {
    %c0_i32 = arith.constant 0 : i32
    %c0_i32_0 = arith.constant 0 : i32
    %c0_i32_1 = arith.constant 0 : i32
    return %arg0, %c0_i32, %c0_i32_0 : i32, i32, i32
  }
  func.func @transform_1(%arg0: i32) -> (i32, i32) {
    %c0_i32 = arith.constant 0 : i32
    %c0_i32_0 = arith.constant 0 : i32
    return %arg0, %c0_i32 : i32, i32
  }
  func.func @transform_2(%arg0: i32) -> (i32, i32) {
    %c0_i32 = arith.constant 0 : i32
    %c0_i32_0 = arith.constant 0 : i32
    return %arg0, %c0_i32 : i32, i32
  }
  func.func @transform_3(%arg0: i32) -> (i32, i32) {
    %c0_i32 = arith.constant 0 : i32
    %c0_i32_0 = arith.constant 0 : i32
    %c0_i32_1 = arith.constant 0 : i32
    return %c0_i32, %c0_i32_0 : i32, i32
  }
  func.func @transform_4(%arg0: i32) -> (i32, i32) {
    %c0_i32 = arith.constant 0 : i32
    %c0_i32_0 = arith.constant 0 : i32
    %c0_i32_1 = arith.constant 0 : i32
    return %c0_i32, %c0_i32_0 : i32, i32
  }
  func.func @transform_5(%arg0: i32) -> (i32, i32) {
    %c0_i32 = arith.constant 0 : i32
    %c0_i32_0 = arith.constant 0 : i32
    %c0_i32_1 = arith.constant 0 : i32
    return %c0_i32, %c0_i32_0 : i32, i32
  }
  func.func @transform_6(%arg0: i32) -> (i32, i32) {
    %c0_i32 = arith.constant 0 : i32
    %c0_i32_0 = arith.constant 0 : i32
    %c0_i32_1 = arith.constant 0 : i32
    return %c0_i32, %c0_i32_0 : i32, i32
  }
  func.func @transform_7(%arg0: i32) -> (i32, i32) {
    %c0_i32 = arith.constant 0 : i32
    %c0_i32_0 = arith.constant 0 : i32
    return %arg0, %c0_i32 : i32, i32
  }
}

</mosaic_0001>

<bundles_post_ra>
// kernel: tpu_custom_call.1
= control target key start
LH: loop header
LB: loop body
LE: loop exit
PB: predicated region body
PF: predicated region fallthrough
CT: control target
= control target key end

     0   :  { %13 = vsyncpa [#allocation4], 0  ;;  %s783_s0 = inlined_call_operand.hbm [shape: f32[2,8,32], index: 0, kind: input, shape index: {}]   ;;  %s784_s1 = inlined_call_operand.vmem [shape: f32[2,64], index: 1, kind: input, shape index: {}]   ;;  %s785_s2 = inlined_call_operand.hbm [shape: f32[2,8], index: 2, kind: input, shape index: {}]   ;;  %s786_s3 = inlined_call_operand.hbm [shape: f32[32,32], index: 3, kind: input, shape index: {}]   ;;  %s787_s4 = inlined_call_operand.hbm [shape: f32[64,64], index: 4, kind: input, shape index: {}]   ;;  %s788_s5 = inlined_call_operand.vmem [shape: f32[3,32], index: 5, kind: input, shape index: {}]   ;;  %s789_s6 = inlined_call_operand.<no memory space> [shape: f32[1,1], index: 6, kind: input, shape index: {}]   ;;  %s790_s7 = inlined_call_operand.hbm [shape: f32[2,32], index: 7, kind: output, shape index: {}]  }
   0x1   :  { %14 = vsyncpa [#allocation7], 0 }
   0x2   :  { %15 = vsyncpa [#allocation10], 0 }
   0x3   :  { %16 = vsyncpa [#allocation5], 0  ;;  %s664_s24 = smov [#allocation6]   ;;  %s665_s26 = smov [#allocation3]  }
   0x4   :  { %s37_s25 = sshll.u32 %s664_s24, 4  ;;  %s22_s27 = sshll.u32 %s665_s26, 4  ;;  %s38_s25 = int_to_ptr.vmem [resolvable:$true] %s37_s25  ;;  %s23_s27 = int_to_ptr.vmem [resolvable:$true] %s22_s27 }
   0x5   :  { %s564_s28 = scalar_lea.vmem %s38_s25, 32  ;;  %p569_p1 = scmp.lt.s32.totalorder %s38_s25, %s38_s25 }
   0x6   :  { %p565_p0 = scmp.ne.s32.totalorder %s38_s25, %s564_s28  ;;  %p570_p2 = scmp.lt.s32.totalorder %s564_s28, %s564_s28 }
   0x8   :  { %p571_p3 = por %p570_p2, %p569_p1 }
   0xa   :  { %p572_p4 = pnand %p571_p3, %p565_p0 }
   0xc   :  { %575 = shalt.err (!%p572_p4)
}
   0xd   :  { %40 = dma.hbm_to_vmem [thread:$0]  %s785_s2, 32, %s38_s25, [#allocation7]  }
   0xe   :  { %s584_s8 = scalar_lea.vmem %s23_s27, 256  ;;  %p589_p6 = scmp.lt.s32.totalorder %s23_s27, %s23_s27 }
   0xf   :  { %p585_p5 = scmp.ne.s32.totalorder %s23_s27, %s584_s8  ;;  %p590_p7 = scmp.lt.s32.totalorder %s584_s8, %s584_s8 }
  0x11   :  { %p591_p8 = por %p590_p7, %p589_p6 }
  0x13   :  { %p592_p9 = pnand %p591_p8, %p585_p5 }
  0x15   :  { %595 = shalt.err (!%p592_p9)
}
  0x16   :  { %s666_s9 = smov 128   ;;  %s667_s10 = smov 8  }
  0x17   :  { %28 = dma.hbm_to_vmem [thread:$0]  %s783_s0, 256, %s23_s27, [#allocation4], %s666_s9, %s666_s9, %s667_s10  }
  0x18   :  { %s668_s13 = smov [#allocation8]   ;;  %s669_s15 = smov [#allocation9]  }
  0x19   :  { %s46_s14 = sshll.u32 %s668_s13, 4  ;;  %s58_s16 = sshll.u32 %s669_s15, 4  ;;  %s47_s14 = int_to_ptr.vmem [resolvable:$true] %s46_s14  ;;  %s59_s16 = int_to_ptr.vmem [resolvable:$true] %s58_s16 }
  0x1a   :  { %s604_s2 = scalar_lea.vmem %s47_s14, 512  ;;  %p609_p11 = scmp.lt.s32.totalorder %s47_s14, %s47_s14 }
  0x1b   :  { %p605_p10 = scmp.ne.s32.totalorder %s47_s14, %s604_s2  ;;  %p610_p12 = scmp.lt.s32.totalorder %s604_s2, %s604_s2 }
  0x1d   :  { %p611_p13 = por %p610_p12, %p609_p11 }
  0x1f   :  { %p612_p0 = pnand %p611_p13, %p605_p10 }
  0x21   :  { %615 = shalt.err (!%p612_p0)
}
  0x22   :  { %52 = dma.hbm_to_vmem [thread:$0]  %s786_s3, 512, %s47_s14, [#allocation7], %s666_s9, %s666_s9, %s667_s10  }
  0x23   :  { %s624_s19 = scalar_lea.vmem %s59_s16, 1024  ;;  %p629_p2 = scmp.lt.s32.totalorder %s59_s16, %s59_s16 }
  0x24   :  { %p625_p1 = scmp.ne.s32.totalorder %s59_s16, %s624_s19  ;;  %p630_p3 = scmp.lt.s32.totalorder %s624_s19, %s624_s19 }
  0x26   :  { %p631_p4 = por %p630_p3, %p629_p2 }
  0x28   :  { %p632_p5 = pnand %p631_p4, %p625_p1 }
  0x2a   :  { %635 = shalt.err (!%p632_p5)
}
  0x2b   :  { %64 = dma.hbm_to_vmem [thread:$0]  %s787_s4, 1024, %s59_s16, [#allocation10], %s666_s9, %s666_s9, %s667_s10  }
  0x2c   :  { %656 = dma.done.wait [#allocation4], 256  }
  0x2d   :  { %657 = vsyncadd [#allocation4], 4294967040 }
  0x2e   :  { %658 = dma.done.wait [#allocation7], 544  }
  0x2f   :  { %659 = vsyncadd [#allocation7], 4294966752 }
  0x30   :  { %660 = dma.done.wait [#allocation10], 1024  }
  0x31   :  { %661 = vsyncadd [#allocation10], 4294966272  ;;  %v670_v0 = vmov 0.0   ;;  %vm671_vm0 = vmmov 0   ;;  %v177_v1 = vld [vmem:[#allocation9 + $0x38] sm:$0xff]  ;;  %v176_v2 = vld [vmem:[#allocation9 + $0x30] sm:$0xff]  ;;  %v267_v16 = vlaneseq  ;;  %v320_v51 = vstv %s789_s6 }
  0x32   :  { %508 = vmatprep.subr.mxu1 %v670_v0  ;;  %524 = vmatprep.mubr.msk.f32.mxu1 %vm671_vm0, %v670_v0  ;;  %v86_v3 = vld [vmem:[#allocation8 + $0x18] sm:$0xff]  ;;  %v175_v4 = vld [vmem:[#allocation9 + $0x28] sm:$0xff]  ;;  %v85_v5 = vld [vmem:[#allocation8 + $0x10] sm:$0xff]  ;;  %vm87_vm1 = vcmask 261120   ;;  %vm178_vm2 = vcmask 523264   ;;  %s673_s26 = smov 32  }
  0x33   :  { %509 = vmatpush3.msra.mxu1 %v177_v1  ;;  %497 = vmatprep.subr.mxu0 %v86_v3  ;;  %v84_v6 = vld [vmem:[#allocation8 + $0x8] sm:$0xff]  ;;  %v174_v7 = vld [vmem:[#allocation9 + $0x20] sm:$0xff]  ;;  %v173_v9 = vld [vmem:[#allocation9 + $0x18] sm:$0xff]  ;;  %v268_v17 = vshrl.u32 %v267_v16, 7  ;;  %v326_v18 = vand.u32 127, %v267_v16  ;;  %vm335_vm3 = vcmask 1041409  }
  0x34   :  { %510 = vmatprep.subr.mxu1 %v670_v0  ;;  %498 = vmatpush3.msra.mxu0 %v86_v3  ;;  %v83_v8 = vld [vmem:[#allocation8] sm:$0xff]  ;;  %v729_v10 = vld [vmem:[#allocation3] sm:$0xff]  ;;  %v731_v12 = vld [vmem:[#allocation3 + $0x8] sm:$0xff]  ;;  %v672_v20 = vmov 1966171168   ;;  %vm338_vm4 = vcmask 58368  }
  0x35   :  { %511 = vmatpush3.msra.mxu1 %v176_v2  ;;  %499 = vmatprep.subr.mxu0 %v85_v5  ;;  %v172_v11 = vld [vmem:[#allocation9 + $0x10] sm:$0xff]  ;;  %v171_v13 = vld [vmem:[#allocation9 + $0x8] sm:$0xff]  ;;  %v170_v14 = vld [vmem:[#allocation9] sm:$0xff]  ;;  %v740_v19 = vsub.s32 %v326_v18, %v268_v17  ;;  %v265_v21 = vunpack.c.l.s4 %v672_v20  ;;  %v745_v26 = vsub.s32 0, %v268_v17  ;;  %v349_v47 = vsub.s32 1, %v268_v17  ;;  %s676_s6 = smov [#allocation11]  }
  0x36   :  { %512 = vmatprep.subr.mxu1 %v670_v0  ;;  %500 = vmatpush3.msra.mxu0 %v85_v5  ;;  %v169_v15 = vld [vmem:[%s784_s1] sm:$0x3]  ;;  %v481_v40 = vld [vmem:[%s788_s5 + $0x2] ss:$0 sm:$0xff]  ;;  %v359_v48 = vld [vmem:[#allocation6] sm:$0x3] }
  0x37   :  { %513 = vmatpush3.msra.mxu1 %v175_v4  ;;  %501 = vmatprep.subr.mxu0 %v84_v6  ;;  %v266_v22 = vunpack.c.0.s8 %v265_v21  ;;  %v480_v33 = vld [vmem:[%s788_s5] ss:$0 sm:$0xff]  ;;  %v371_v49 = vrot.slane %v359_v48, %v349_v47  ;;  %v479_v50 = vld [vmem:[%s788_s5 + $0x1] ss:$0 sm:$0xff]  ;;  %v364_v60 = vrot.slane %v359_v48, %v745_v26  ;;  %v674_v61 = vmov 0   ;;  %s675_s5 = smov 96  }
  0x38   :  { %514 = vmatprep.subr.mxu1 %v670_v0  ;;  %502 = vmatpush3.msra.mxu0 %v84_v6  ;;  %s465_s29 = sshll.u32 %s676_s6, 4  ;;  %vm457_vm5 = vcmask 254976   ;;  %s466_s29 = int_to_ptr.vmem [resolvable:$true] %s465_s29 }
  0x39   :  { %515 = vmatpush3.msra.mxu1 %v174_v7  ;;  %503 = vmatprep.subr.mxu0 %v83_v8  ;;  %v269_v23 = vsub.s32 %v266_v22, %v268_v17  ;;  %s636_s30 = scalar_lea.vmem %s466_s29, 32  ;;  %p641_p7 = scmp.lt.s32.totalorder %s466_s29, %s466_s29 }
  0x3a   :  { %516 = vmatprep.subr.mxu1 %v670_v0  ;;  %504 = vmatpush3.msra.mxu0 %v83_v8  ;;  %p637_p6 = scmp.ne.s32.totalorder %s466_s29, %s636_s30  ;;  %p642_p8 = scmp.lt.s32.totalorder %s636_s30, %s636_s30 }
  0x3b   :  { %517 = vmatpush3.msra.mxu1 %v173_v9  ;;  %505 = vmatprep.mubr.msk.f32.mxu0 %vm87_vm1, %v729_v10 }
  0x3c   :  { %518 = vmatprep.subr.mxu1 %v670_v0  ;;  %506 = vmatmul.mubr.msk.f32.vlgmr.msra.gmra.mxu0 %vm87_vm1, %v731_v12  ;;  %p643_p9 = por %p642_p8, %p641_p7 }
  0x3d   :  { %519 = vmatpush3.msra.mxu1 %v172_v11  ;;  %540 = vset.pattern.permute.xlu1 %v674_v61 }
  0x3e   :  { %520 = vmatprep.subr.mxu1 %v670_v0  ;;  %541 = vset.pattern.permute.xlu0 %v674_v61  ;;  %p644_p10 = pnand %p643_p9, %p637_p6 }
  0x3f   :  { %521 = vmatpush3.msra.mxu1 %v171_v13 }
  0x40   :  { %522 = vmatprep.subr.mxu1 %v670_v0 }
  0x41   :  { %523 = vmatpush3.msra.mxu1 %v170_v14 }
  0x42   :  { %525 = vmatmul.mubr.msk.f32.vlgmr.msra.gmra.mxu1 %vm178_vm2, %v169_v15 }
  0xfc   :  { %v507_v27 = vpop.f32.mrf.mxu0 }
  0xfe   :  { %v160_v34 = vpop.f32.mrf.mxu0 }
 0x102   :  { %v742_v24 = vpop.f32.mrf.mxu1 }
 0x103   :  { %v270_v25 = vrot.slane %v742_v24, %v269_v23 }
 0x104   :  { %v526_v28 = vpop.f32.mrf.mxu1 }
 0x105   :  { %v271_v29 = vcombine.high %v270_v25, %v270_v25  ;;  %v278_v30 = vrot.slane %v270_v25, %v269_v23 }
 0x107   :  { %v285_v31 = vrot.slane %v271_v29, %v269_v23  ;;  %v289_v32 = vrot.slane %v278_v30, %v745_v26 }
 0x109   :  { %v293_v35 = vrot.slane %v285_v31, %v745_v26  ;;  %v296_v36 = vadd.f32 %v289_v32, %v160_v34 }
 0x10b   :  { %v297_v37 = vadd.f32 %v507_v27, %v293_v35  ;;  %v302_v38 = vadd.f32 %v480_v33, %v296_v36 }
 0x10d   :  { %v303_v39 = vadd.f32 %v480_v33, %v297_v37  ;;  %542 = vtanh.f32 %v302_v38 }
 0x10f   :  { %544 = vtanh.f32 %v303_v39 }
 0x11a   :  { %v543_v41 = vpop.eup %542 }
 0x11b   :  { %v311_v42 = vmul.f32 %v543_v41, %v481_v40 }
 0x11c   :  { %v545_v43 = vpop.eup %544 }
 0x11d   :  { %v313_v44 = vsel %vm87_vm1, %v311_v42, 0.0  ;;  %v312_v45 = vmul.f32 %v545_v43, %v481_v40 }
 0x11e   :  { %314 = vadd.xlane.f32.xlu0 %v313_v44 }
 0x11f   :  { %v316_v46 = vsel %vm87_vm1, %v312_v45, 0.0 }
 0x122   :  { %317 = vadd.xlane.f32.xlu0 %v316_v46 }
 0x138   :  { %373 = vbcast.lane.b32.xlu0 %v371_v49, 256 }
 0x13c   :  { %258 = vrot.lane.b32.xlu0 %v479_v50, %s673_s26 }
 0x1a7   :  { %v315_v52 = vpop.xlane.xlu0 %314 }
 0x1a8   :  { %v321_v53 = vadd.f32 %v320_v51, %v315_v52 }
 0x1aa   :  { %v330_v56 = vrot.slane %v321_v53, %v740_v19 }
 0x1ab   :  { %v318_v54 = vpop.xlane.xlu0 %317 }
 0x1ac   :  { %v322_v55 = vadd.f32 %v320_v51, %v318_v54 }
 0x1ae   :  { %v334_v57 = vrot.slane %v322_v55, %v740_v19 }
 0x1af   :  { %v374_v9 = vpop.permute.xlu0 %373 }
 0x1b0   :  { %v336_v58 = vsel %vm335_vm3, %v334_v57, %v330_v56 }
 0x1b1   :  { %v339_v59 = vsel %vm338_vm4, %v336_v58, -inf }
 0x1b2   :  { %340 = vmax.xlane.f32.xlu1 %v339_v59 }
 0x1b3   :  { %v259_v23 = vpop.permute.xlu0 %258 }
 0x1b4   :  { %v261_v25 = vadd.f32 %v259_v23, %v742_v24 }
 0x1c3   :  { %366 = vbcast.lane.b32.xlu1 %v364_v60, 256 }
 0x23b   :  { %v341_v62 = vpop.xlane.xlu1 %340 }
 0x23c   :  { %v346_v63 = vrot.slane %v341_v62, %v745_v26  ;;  %v350_v0 = vrot.slane %v341_v62, %v349_v47 }
 0x23e   :  { %v353_v1 = vsub.f32 %v321_v53, %v346_v63  ;;  %v354_v2 = vsub.f32 %v322_v55, %v350_v0 }
 0x23f   :  { %v367_v5 = vpop.permute.xlu1 %366 }
 0x240   :  { %v355_v3 = vmul.f32 1.442695, %v353_v1  ;;  %v357_v4 = vmul.f32 1.442695, %v354_v2 }
 0x242   :  { %546 = vpow2.f32 %v355_v3 }
 0x243   :  { %548 = vpow2.f32 %v357_v4 }
 0x24f   :  { %v547_v6 = vpop.eup %546 }
 0x250   :  { %v377_v7 = vmul.f32 %v547_v6, %v367_v5  ;;  %v549_v8 = vpop.eup %548 }
 0x251   :  { %v378_v11 = vmul.f32 %v549_v8, %v374_v9 }
 0x252   :  { %382 = vperm.xlu1 %540, %v377_v7  }
 0x256   :  { %385 = vperm.xlu1 %540, %v378_v11  }
 0x2cd   :  { %v383_v13 = vpop.permute.xlu1 %382 }
 0x2ce   :  { %v390_v15 = vrot.slane %v383_v13, %v740_v19 }
 0x2d1   :  { %v386_v14 = vpop.permute.xlu1 %385 }
 0x2d2   :  { %v394_v16 = vrot.slane %v386_v14, %v740_v19 }
 0x2d4   :  { %v395_v17 = vsel %vm335_vm3, %v394_v16, %v390_v15 }
 0x2d5   :  { %v397_v18 = vsel %vm338_vm4, %v395_v17, 0.0 }
 0x2d6   :  { %398 = vadd.xlane.f32.xlu1 %v397_v18 }
 0x35f   :  { %v399_v20 = vpop.xlane.xlu1 %398 }
 0x360   :  { %v408_v21 = vrot.slane %v399_v20, %v349_v47  ;;  %v404_v22 = vrot.slane %v399_v20, %v745_v26 }
 0x362   :  { %550 = vrcp.f32 %v408_v21 }
 0x363   :  { %552 = vrcp.f32 %v404_v22 }
 0x364   :  { %554 = vtanh.f32 %v261_v25 }
 0x36f   :  { %v551_v27 = vpop.eup %550 }
 0x370   :  { %v414_v28 = vmul.f32 %v551_v27, %v378_v11  ;;  %v553_v29 = vpop.eup %552 }
 0x371   :  { %v412_v19 = vmul.f32 %v553_v29, %v377_v7  ;;  %v555_v30 = vpop.eup %554 }
 0x372   :  { %422 = vperm.xlu0 %541, %v414_v28   ;;  %v443_v31 = vrot.slane %v555_v30, 1 }
 0x376   :  { %417 = vperm.xlu0 %541, %v412_v19  }
 0x37a   :  { %446 = vrot.lane.b32.xlu0 %v443_v31, %s675_s5 }
 0x37e   :  { %444 = vrot.lane.b32.xlu0 %v555_v30, %s675_s5 }
 0x3ed   :  { %v423_v32 = vpop.permute.xlu0 %422 }
 0x3ee   :  { %v426_v26 = vmul.f32 %v423_v32, %v731_v12 }
 0x3f0   :  { %v434_v33 = vsel %vm87_vm1, %v426_v26, 0.0 }
 0x3f1   :  { %v435_v34 = vrot.slane %v434_v33, 4  ;;  %v418_v24 = vpop.permute.xlu0 %417 }
 0x3f2   :  { %v425_v35 = vmul.f32 %v418_v24, %v729_v10 }
 0x3f3   :  { %v436_v36 = vadd.f32 %v435_v34, %v434_v33 }
 0x3f4   :  { %v427_v37 = vsel %vm87_vm1, %v425_v35, 0.0 }
 0x3f5   :  { %v437_v38 = vrot.slane %v436_v36, 2  ;;  %v428_v39 = vrot.slane %v427_v37, 4  ;;  %v447_v44 = vpop.permute.xlu0 %446 }
 0x3f7   :  { %v429_v40 = vadd.f32 %v428_v39, %v427_v37  ;;  %v438_v41 = vadd.f32 %v437_v38, %v436_v36 }
 0x3f9   :  { %v430_v42 = vrot.slane %v429_v40, 2  ;;  %v439_v43 = vrot.slane %v438_v41, 1  ;;  %v445_v49 = vpop.permute.xlu0 %444 }
 0x3fb   :  { %v440_v45 = vadd.f32 %v439_v43, %v438_v41  ;;  %v431_v46 = vadd.f32 %v430_v42, %v429_v40 }
 0x3fd   :  { %v451_v47 = vadd.f32 %v447_v44, %v440_v45  ;;  %v432_v12 = vrot.slane %v431_v46, 1 }
 0x3ff   :  { %v433_v48 = vadd.f32 %v432_v12, %v431_v46  ;;  %v454_v50 = vrot.slane %v451_v47, 7 }
 0x401   :  { %v450_v10 = vadd.f32 %v445_v49, %v433_v48 }
 0x403   :  { %v455_v51 = vsel %vm335_vm3, %v454_v50, %v450_v10 }
 0x404   :  { %458 = vst.msk [vmem:[#allocation11] sm:$0x3] %vm457_vm5, %v455_v51 }
 0x405   :  { %647 = shalt.err (!%p644_p10)
}
 0x406   :  { %468 = dma.vmem_to_hbm [thread:$0]  %s466_s29, 32, %s790_s7, [#allocation5]  }
 0x407   :  { %662 = dma.done.wait [#allocation5], 32  }
 0x408   :  { %663 = vsyncadd [#allocation5], 4294967264 }
 0x409   :  { %472 = vsyncpa [#allocation4], 1 }
 0x40a   :  { %473 = vsyncpa [#allocation7], 1 }
 0x40b   :  { %474 = vsyncpa [#allocation10], 1 }
 0x40c   :  { %475 = vsyncpa [#allocation5], 1 }

</bundles_post_ra>
